<compile_context>
chip_gen: v7x
topology: tpu7x:2x2x1
jax: 0.10.0
libtpu: 0.0.40
codegen_flags: <defaults>
</compile_context>

<pallas_src>
import jax
import jax.numpy as jnp
from jax import lax
from jax.experimental import pallas as pl
from jax.experimental.pallas import tpu as pltpu


def _round_up(a, m):
    return -(-a // m) * m


def _make_kernel(P, E, has_segment):
    """Kernel over one row tile: TLp packed rows, each holding P tokens."""

    def kernel(*refs):
        if has_segment:
            ids_ref, iid_ref, pos_ref, seg_tab_ref, gb_ref, out_ref = refs
        else:
            ids_ref, iid_ref, pos_ref, gb_ref, out_ref = refs

        iid_tab = iid_ref[...]                       # (V+1, E) f32, VMEM-resident
        gamma = gb_ref[0:1, :]                       # (1, E)
        beta = gb_ref[1:2, :]                        # (1, E)
        if has_segment:
            seg_tab = seg_tab_ref[...]               # (3, E)
            row0 = seg_tab[0:1, :]
            row1 = seg_tab[1:2, :]
            row2 = seg_tab[2:3, :]

        ids = ids_ref[...]                           # (TLp, P) or (TLp, 2P) int32
        tlp = ids.shape[0]
        vp = iid_tab.shape[0]
        col = lax.broadcasted_iota(jnp.int32, (tlp, vp), 1)   # hoisted out of loop

        # Static unrolled loop over the P token slots packed into each row.
        for j in range(P):
            tok = ids[:, j:j + 1]                    # (TLp, 1) token ids
            # --- token embedding: one-hot @ table on the MXU (tiny vocab) ----
            onehot = (tok == col).astype(jnp.float32)
            x = jnp.dot(onehot, iid_tab, preferred_element_type=jnp.float32)
            # --- position embedding: precomputed tile-constant slab ----------
            x = x + pos_ref[j]                       # (TLp, E)
            # --- segment embedding: VPU select over the 3 table rows ---------
            if has_segment:
                sj = ids[:, P + j:P + j + 1]         # (TLp, 1) segment ids
                x = x + jnp.where(sj == 1, row1, jnp.where(sj == 2, row2, row0))
            # --- LayerNorm over E, eps = 1e-6 ---------------------------------
            mean = jnp.mean(x, axis=-1, keepdims=True)
            var = jnp.mean((x - mean) ** 2, axis=-1, keepdims=True)
            y = (x - mean) * lax.rsqrt(var + 1e-6) * gamma + beta
            # --- lane-dense store: slot j occupies lanes [j*E, (j+1)*E) -------
            out_ref[:, j * E:(j + 1) * E] = y

    return kernel


def bert_embeddings(seq, segment_label, iid_tab, pos_tab, seg_tab, gamma, beta,
                    *, row_tile_target=1024):
    """seq, segment_label: (B, L) int32.  Returns (B, L, E) float32."""
    B, L = seq.shape
    maxlen = pos_tab.shape[0]
    Vp, E = iid_tab.shape
    if L > maxlen:
        raise ValueError(f"sequence length {L} exceeds maxlen {maxlen}")

    has_segment = segment_label is not None

    # Lane-packing factor: pack P tokens into each 128-lane output row.
    P = 128 // E if (E < 128 and 128 % E == 0) else 1

    # Pad L so every block satisfies the (8, 128) divisibility rule.
    L_pad = _round_up(L, 8 * P)
    R = B * L_pad                 # total flattened token rows
    Rp = R // P                   # packed output rows

    # Sequences per tile: largest divisor of B whose tile fits the row target.
    fits = [d for d in range(1, B + 1)
            if B % d == 0 and d * L_pad <= max(row_tile_target, L_pad)]
    pb = max(fits)
    TL = pb * L_pad               # flattened rows per tile (whole sequences)
    TLp = TL // P                 # packed rows per tile (multiple of 8)
    n_tiles = B // pb

    # Token table must fit VMEM (with its default double buffer) on v7x too.
    tab_bytes = 2 * _round_up(Vp, 8) * _round_up(E, 128) * 4
    if tab_bytes > (12 << 20):
        # TODO(synk): large-vocab path -> keep iid_tab in HBM (pl.ANY) and
        # DMA-gather rows per tile instead of a VMEM-resident one-hot matmul.
        raise NotImplementedError("token table too large for VMEM-resident path")

    f32 = jnp.float32

    # ---- inputs -------------------------------------------------------------
    seq_p = jnp.zeros((B, L_pad), jnp.int32).at[:, :L].set(seq.astype(jnp.int32))
    if has_segment:
        seg_p = jnp.zeros((B, L_pad), jnp.int32).at[:, :L].set(
            segment_label.astype(jnp.int32))
        ids = jnp.concatenate([seq_p.reshape(Rp, P), seg_p.reshape(Rp, P)],
                              axis=1)               # (Rp, 2P): tokens | segments
    else:
        ids = seq_p.reshape(Rp, P)                  # (Rp, P)
    id_cols = ids.shape[1]

    iid_tab = iid_tab.astype(f32)
    seg_tab = seg_tab.astype(f32)
    gb = jnp.stack([gamma.astype(f32), beta.astype(f32)], axis=0)   # (2, E)

    # Position slab: tiles cover whole padded sequences, so the position
    # pattern is tile-invariant.  pos_slab[j, r] = pos_emb[(r*P + j) % L_pad].
    pos_padded = jnp.zeros((L_pad, E), f32).at[:L].set(pos_tab[:L].astype(f32))
    pos_rows = pos_padded[jnp.arange(TL) % L_pad]                 # (TL, E)
    pos_slab = pos_rows.reshape(TLp, P, E).transpose(1, 0, 2)     # (P, TLp, E)

    # ---- specs --------------------------------------------------------------
    in_specs = [
        pl.BlockSpec((TLp, id_cols), lambda i: (i, 0)),       # packed ids
        pl.BlockSpec((Vp, E), lambda i: (0, 0)),              # token table (resident)
        pl.BlockSpec((P, TLp, E), lambda i: (0, 0, 0)),       # position slab (resident)
    ]
    inputs = [ids, iid_tab, pos_slab]
    if has_segment:
        in_specs.append(pl.BlockSpec((3, E), lambda i: (0, 0)))   # segment table
        inputs.append(seg_tab)
    in_specs.append(pl.BlockSpec((2, E), lambda i: (0, 0)))       # gamma/beta packed
    inputs.append(gb)

    out_specs = pl.BlockSpec((TLp, P * E), lambda i: (i, 0))      # lane-dense slab

    # ---- VMEM budget: double-buffered tiles + resident tables, with slack ---
    lane, sub = 128, 8
    e_pad = _round_up(E, lane)
    tlp_pad = _round_up(TLp, sub)
    per_tile = 2 * 4 * tlp_pad * (lane + _round_up(P * E, lane))      # ids + out
    resident = (2 * 4 * e_pad * (_round_up(Vp, sub) + 2 * sub)        # tables
                + 2 * 4 * P * tlp_pad * e_pad)                        # pos slab
    vmem_bytes = int(min(max(2 * (per_tile + resident) + (1 << 20), 4 << 20),
                         40 << 20))                                   # v7x-safe cap

    cost = pl.CostEstimate(
        flops=2 * R * Vp * E + 10 * R * E,
        transcendentals=R,
        bytes_accessed=4 * (Rp * id_cols + Vp * E + P * TLp * E + 5 * E + R * E),
    )

    out_packed = pl.pallas_call(
        _make_kernel(P, E, has_segment),
        out_shape=jax.ShapeDtypeStruct((Rp, P * E), f32),
        grid_spec=pltpu.PrefetchScalarGridSpec(
            num_scalar_prefetch=0,
            grid=(n_tiles,),
            in_specs=in_specs,
            out_specs=out_specs,
        ),
        compiler_params=pltpu.CompilerParams(
            dimension_semantics=("parallel",),
            vmem_limit_bytes=vmem_bytes,
        ),
        cost_estimate=cost,
    )(*inputs)

    # Free row-major reshape back to (B, L_pad, E), then crop the L padding.
    return out_packed.reshape(B, L_pad, E)[:, :L, :]


def reference(seq, segment_label, iid_tab, pos_tab, seg_tab, gamma, beta):
    """Pure-JAX reference of the PyTorch forward (eval mode)."""
    B, L = seq.shape
    x = iid_tab[seq] + pos_tab[jnp.arange(L)][None, :, :]
    if segment_label is not None:
        x = x + seg_tab[segment_label]
    mean = jnp.mean(x, axis=-1, keepdims=True)
    var = jnp.mean((x - mean) ** 2, axis=-1, keepdims=True)
    return (x - mean) / jnp.sqrt(var + 1e-6) * gamma + beta


if __name__ == "__main__":
    # Module hyperparameters (small, consistent with the PyTorch module).
    vocab_size = 50
    embed_size = 32
    maxlen = 16
    B, L = 2, 8

    key = jax.random.PRNGKey(0)
    k_iid, k_pos, k_seg, k_seq, k_lab = jax.random.split(key, 5)

    # Deterministic parameter init (BERT-style N(0, 0.02)); padding_idx=0 rows zeroed.
    iid_tab = 0.02 * jax.random.normal(k_iid, (vocab_size + 1, embed_size), jnp.float32)
    iid_tab = iid_tab.at[0].set(0.0)                       # padding_idx=0
    pos_tab = 0.02 * jax.random.normal(k_pos, (maxlen, embed_size), jnp.float32)
    seg_tab = 0.02 * jax.random.normal(k_seg, (3, embed_size), jnp.float32)
    seg_tab = seg_tab.at[0].set(0.0)                       # padding_idx=0
    gamma = jnp.ones((embed_size,), jnp.float32)           # nn.LayerNorm default
    beta = jnp.zeros((embed_size,), jnp.float32)

    # Deterministic inputs.
    seq = jax.random.randint(k_seq, (B, L), 1, vocab_size + 1, dtype=jnp.int32)
    seq = seq.at[:, -2:].set(0)                            # some padding tokens
    segment_label = jax.random.randint(k_lab, (B, L), 0, 3, dtype=jnp.int32)

    out = bert_embeddings(seq, segment_label, iid_tab, pos_tab, seg_tab, gamma, beta)
    out = jax.block_until_ready(out)
    ref = reference(seq, segment_label, iid_tab, pos_tab, seg_tab, gamma, beta)
    assert out.shape == (B, L, embed_size)
    assert jnp.allclose(out, ref, atol=1e-4, rtol=1e-4), "mismatch vs reference"

    # Also exercise the specialized segment_label=None path.
    out2 = jax.block_until_ready(
        bert_embeddings(seq, None, iid_tab, pos_tab, seg_tab, gamma, beta))
    ref2 = reference(seq, None, iid_tab, pos_tab, seg_tab, gamma, beta)
    assert jnp.allclose(out2, ref2, atol=1e-4, rtol=1e-4), "mismatch vs reference (no seg)"

    print("KERNEL_OK")
</pallas_src>

<mosaic_0001>
module attributes {stable_mosaic.version = 11 : i64} {
  func.func @kernel(%arg0: i32, %arg1: memref<16x8xi32, #tpu.memory_space<vmem>>, %arg2: memref<51x32xf32, #tpu.memory_space<vmem>>, %arg3: memref<4x16x32xf32, #tpu.memory_space<vmem>>, %arg4: memref<3x32xf32, #tpu.memory_space<vmem>>, %arg5: memref<2x32xf32, #tpu.memory_space<vmem>>, %arg6: memref<16x128xf32, #tpu.memory_space<vmem>>) attributes {dimension_semantics = [#tpu.dimension_semantics<parallel>], iteration_bounds = array<i64: 1>, scalar_prefetch = 0 : i64, scratch_operands = 0 : i64, tpu.core_type = #tpu.core_type<tc>, window_params = [{transform_indices = @transform_0, window_bounds = array<i64: 16, 8>}, {pipeline_mode = #tpu.pipeline_mode<synchronous>, transform_indices = @transform_1, window_bounds = array<i64: 51, 32>}, {pipeline_mode = #tpu.pipeline_mode<synchronous>, transform_indices = @transform_2, window_bounds = array<i64: 4, 16, 32>}, {pipeline_mode = #tpu.pipeline_mode<synchronous>, transform_indices = @transform_3, window_bounds = array<i64: 3, 32>}, {pipeline_mode = #tpu.pipeline_mode<synchronous>, transform_indices = @transform_4, window_bounds = array<i64: 2, 32>}, {transform_indices = @transform_5, window_bounds = array<i64: 16, 128>}]} {
    %c0 = arith.constant 0 : index
    %c0_0 = arith.constant 0 : index
    %0 = vector.load %arg2[%c0, %c0_0] : memref<51x32xf32, #tpu.memory_space<vmem>>, vector<51x32xf32>
    %c0_1 = arith.constant 0 : index
    %c0_2 = arith.constant 0 : index
    %1 = vector.load %arg5[%c0_1, %c0_2] : memref<2x32xf32, #tpu.memory_space<vmem>>, vector<1x32xf32>
    %c1 = arith.constant 1 : index
    %c0_3 = arith.constant 0 : index
    %2 = vector.load %arg5[%c1, %c0_3] : memref<2x32xf32, #tpu.memory_space<vmem>>, vector<1x32xf32>
    %c0_4 = arith.constant 0 : index
    %c0_5 = arith.constant 0 : index
    %3 = vector.load %arg4[%c0_4, %c0_5] : memref<3x32xf32, #tpu.memory_space<vmem>>, vector<3x32xf32>
    %4 = vector.extract_strided_slice %3 {offsets = [0, 0], sizes = [1, 32], strides = [1, 1]} : vector<3x32xf32> to vector<1x32xf32>
    %5 = vector.extract_strided_slice %3 {offsets = [1, 0], sizes = [1, 32], strides = [1, 1]} : vector<3x32xf32> to vector<1x32xf32>
    %6 = vector.extract_strided_slice %3 {offsets = [2, 0], sizes = [1, 32], strides = [1, 1]} : vector<3x32xf32> to vector<1x32xf32>
    %c0_6 = arith.constant 0 : index
    %c0_7 = arith.constant 0 : index
    %7 = vector.load %arg1[%c0_6, %c0_7] : memref<16x8xi32, #tpu.memory_space<vmem>>, vector<16x8xi32>
    %8 = tpu.iota {dimensions = array<i32: 1>} : vector<16x51xi32>
    %9 = vector.extract_strided_slice %7 {offsets = [0, 0], sizes = [16, 1], strides = [1, 1]} : vector<16x8xi32> to vector<16x1xi32>
    %10 = vector.broadcast %9 : vector<16x1xi32> to vector<16x51xi32>
    %11 = arith.cmpi eq, %10, %8 : vector<16x51xi32>
    %12 = arith.extui %11 : vector<16x51xi1> to vector<16x51xi32>
    %13 = arith.sitofp %12 : vector<16x51xi32> to vector<16x51xf32>
    %cst = arith.constant dense<0.000000e+00> : vector<16x32xf32>
    %14 = tpu.matmul %13, %0, %cst {dimension_numbers = #tpu.dot_dimension_numbers<[1], [0], [0], [1], [0, 0, 1, 1], [], []>} : vector<16x51xf32>, vector<51x32xf32>, vector<16x32xf32> -> vector<16x32xf32>
    %c0_8 = arith.constant 0 : index
    %c0_9 = arith.constant 0 : index
    %c0_10 = arith.constant 0 : index
    %15 = vector.load %arg3[%c0_8, %c0_9, %c0_10] : memref<4x16x32xf32, #tpu.memory_space<vmem>>, vector<1x16x32xf32>
    %16 = vector.shape_cast %15 : vector<1x16x32xf32> to vector<16x32xf32>
    %17 = arith.addf %14, %16 : vector<16x32xf32>
    %18 = vector.extract_strided_slice %7 {offsets = [0, 4], sizes = [16, 1], strides = [1, 1]} : vector<16x8xi32> to vector<16x1xi32>
    %c1_i32 = arith.constant 1 : i32
    %19 = vector.broadcast %c1_i32 : i32 to vector<16x1xi32>
    %20 = arith.cmpi eq, %18, %19 : vector<16x1xi32>
    %c2_i32 = arith.constant 2 : i32
    %21 = vector.broadcast %c2_i32 : i32 to vector<16x1xi32>
    %22 = arith.cmpi eq, %18, %21 : vector<16x1xi32>
    %23 = vector.shape_cast %22 : vector<16x1xi1> to vector<16x1xi1>
    %24 = vector.broadcast %23 : vector<16x1xi1> to vector<16x32xi1>
    %25 = vector.shape_cast %6 : vector<1x32xf32> to vector<1x32xf32>
    %26 = vector.broadcast %25 : vector<1x32xf32> to vector<16x32xf32>
    %27 = vector.shape_cast %4 : vector<1x32xf32> to vector<1x32xf32>
    %28 = vector.broadcast %27 : vector<1x32xf32> to vector<16x32xf32>
    %29 = arith.select %24, %26, %28 : vector<16x32xi1>, vector<16x32xf32>
    %30 = vector.shape_cast %20 : vector<16x1xi1> to vector<16x1xi1>
    %31 = vector.broadcast %30 : vector<16x1xi1> to vector<16x32xi1>
    %32 = vector.shape_cast %5 : vector<1x32xf32> to vector<1x32xf32>
    %33 = vector.broadcast %32 : vector<1x32xf32> to vector<16x32xf32>
    %34 = arith.select %31, %33, %29 : vector<16x32xi1>, vector<16x32xf32>
    %35 = arith.addf %17, %34 : vector<16x32xf32>
    %cst_11 = arith.constant dense<0.000000e+00> : vector<16xf32>
    %36 = vector.multi_reduction <add>, %35, %cst_11 [1] : vector<16x32xf32> to vector<16xf32>
    %37 = vector.shape_cast %36 : vector<16xf32> to vector<16x1xf32>
    %cst_12 = arith.constant 3.200000e+01 : f32
    %38 = vector.broadcast %cst_12 : f32 to vector<16x1xf32>
    %39 = arith.divf %37, %38 : vector<16x1xf32>
    %40 = vector.broadcast %39 : vector<16x1xf32> to vector<16x32xf32>
    %41 = arith.subf %35, %40 : vector<16x32xf32>
    %42 = arith.mulf %41, %41 : vector<16x32xf32>
    %cst_13 = arith.constant dense<0.000000e+00> : vector<16xf32>
    %43 = vector.multi_reduction <add>, %42, %cst_13 [1] : vector<16x32xf32> to vector<16xf32>
    %44 = vector.shape_cast %43 : vector<16xf32> to vector<16x1xf32>
    %cst_14 = arith.constant 3.200000e+01 : f32
    %45 = vector.broadcast %cst_14 : f32 to vector<16x1xf32>
    %46 = arith.divf %44, %45 : vector<16x1xf32>
    %47 = vector.broadcast %39 : vector<16x1xf32> to vector<16x32xf32>
    %48 = arith.subf %35, %47 : vector<16x32xf32>
    %cst_15 = arith.constant 9.99999997E-7 : f32
    %49 = vector.broadcast %cst_15 : f32 to vector<16x1xf32>
    %50 = arith.addf %46, %49 : vector<16x1xf32>
    %51 = math.rsqrt %50 : vector<16x1xf32>
    %52 = vector.broadcast %51 : vector<16x1xf32> to vector<16x32xf32>
    %53 = arith.mulf %48, %52 : vector<16x32xf32>
    %54 = vector.broadcast %1 : vector<1x32xf32> to vector<16x32xf32>
    %55 = arith.mulf %53, %54 : vector<16x32xf32>
    %56 = vector.broadcast %2 : vector<1x32xf32> to vector<16x32xf32>
    %57 = arith.addf %55, %56 : vector<16x32xf32>
    %c0_16 = arith.constant 0 : index
    %c0_17 = arith.constant 0 : index
    %58 = vector.load %arg6[%c0_16, %c0_17] : memref<16x128xf32, #tpu.memory_space<vmem>>, vector<16x32xf32>
    tpu.vector_store %arg6[%c0_16, %c0_17], %57 {strides = array<i32>} : memref<16x128xf32, #tpu.memory_space<vmem>>, vector<16x32xf32>,
    %59 = vector.extract_strided_slice %7 {offsets = [0, 1], sizes = [16, 1], strides = [1, 1]} : vector<16x8xi32> to vector<16x1xi32>
    %60 = vector.broadcast %59 : vector<16x1xi32> to vector<16x51xi32>
    %61 = arith.cmpi eq, %60, %8 : vector<16x51xi32>
    %62 = arith.extui %61 : vector<16x51xi1> to vector<16x51xi32>
    %63 = arith.sitofp %62 : vector<16x51xi32> to vector<16x51xf32>
    %cst_18 = arith.constant dense<0.000000e+00> : vector<16x32xf32>
    %64 = tpu.matmul %63, %0, %cst_18 {dimension_numbers = #tpu.dot_dimension_numbers<[1], [0], [0], [1], [0, 0, 1, 1], [], []>} : vector<16x51xf32>, vector<51x32xf32>, vector<16x32xf32> -> vector<16x32xf32>
    %c1_19 = arith.constant 1 : index
    %c0_20 = arith.constant 0 : index
    %c0_21 = arith.constant 0 : index
    %65 = vector.load %arg3[%c1_19, %c0_20, %c0_21] : memref<4x16x32xf32, #tpu.memory_space<vmem>>, vector<1x16x32xf32>
    %66 = vector.shape_cast %65 : vector<1x16x32xf32> to vector<16x32xf32>
    %67 = arith.addf %64, %66 : vector<16x32xf32>
    %68 = vector.extract_strided_slice %7 {offsets = [0, 5], sizes = [16, 1], strides = [1, 1]} : vector<16x8xi32> to vector<16x1xi32>
    %c1_i32_22 = arith.constant 1 : i32
    %69 = vector.broadcast %c1_i32_22 : i32 to vector<16x1xi32>
    %70 = arith.cmpi eq, %68, %69 : vector<16x1xi32>
    %c2_i32_23 = arith.constant 2 : i32
    %71 = vector.broadcast %c2_i32_23 : i32 to vector<16x1xi32>
    %72 = arith.cmpi eq, %68, %71 : vector<16x1xi32>
    %73 = vector.shape_cast %72 : vector<16x1xi1> to vector<16x1xi1>
    %74 = vector.broadcast %73 : vector<16x1xi1> to vector<16x32xi1>
    %75 = vector.shape_cast %6 : vector<1x32xf32> to vector<1x32xf32>
    %76 = vector.broadcast %75 : vector<1x32xf32> to vector<16x32xf32>
    %77 = vector.shape_cast %4 : vector<1x32xf32> to vector<1x32xf32>
    %78 = vector.broadcast %77 : vector<1x32xf32> to vector<16x32xf32>
    %79 = arith.select %74, %76, %78 : vector<16x32xi1>, vector<16x32xf32>
    %80 = vector.shape_cast %70 : vector<16x1xi1> to vector<16x1xi1>
    %81 = vector.broadcast %80 : vector<16x1xi1> to vector<16x32xi1>
    %82 = vector.shape_cast %5 : vector<1x32xf32> to vector<1x32xf32>
    %83 = vector.broadcast %82 : vector<1x32xf32> to vector<16x32xf32>
    %84 = arith.select %81, %83, %79 : vector<16x32xi1>, vector<16x32xf32>
    %85 = arith.addf %67, %84 : vector<16x32xf32>
    %cst_24 = arith.constant dense<0.000000e+00> : vector<16xf32>
    %86 = vector.multi_reduction <add>, %85, %cst_24 [1] : vector<16x32xf32> to vector<16xf32>
    %87 = vector.shape_cast %86 : vector<16xf32> to vector<16x1xf32>
    %cst_25 = arith.constant 3.200000e+01 : f32
    %88 = vector.broadcast %cst_25 : f32 to vector<16x1xf32>
    %89 = arith.divf %87, %88 : vector<16x1xf32>
    %90 = vector.broadcast %89 : vector<16x1xf32> to vector<16x32xf32>
    %91 = arith.subf %85, %90 : vector<16x32xf32>
    %92 = arith.mulf %91, %91 : vector<16x32xf32>
    %cst_26 = arith.constant dense<0.000000e+00> : vector<16xf32>
    %93 = vector.multi_reduction <add>, %92, %cst_26 [1] : vector<16x32xf32> to vector<16xf32>
    %94 = vector.shape_cast %93 : vector<16xf32> to vector<16x1xf32>
    %cst_27 = arith.constant 3.200000e+01 : f32
    %95 = vector.broadcast %cst_27 : f32 to vector<16x1xf32>
    %96 = arith.divf %94, %95 : vector<16x1xf32>
    %97 = vector.broadcast %89 : vector<16x1xf32> to vector<16x32xf32>
    %98 = arith.subf %85, %97 : vector<16x32xf32>
    %cst_28 = arith.constant 9.99999997E-7 : f32
    %99 = vector.broadcast %cst_28 : f32 to vector<16x1xf32>
    %100 = arith.addf %96, %99 : vector<16x1xf32>
    %101 = math.rsqrt %100 : vector<16x1xf32>
    %102 = vector.broadcast %101 : vector<16x1xf32> to vector<16x32xf32>
    %103 = arith.mulf %98, %102 : vector<16x32xf32>
    %104 = vector.broadcast %1 : vector<1x32xf32> to vector<16x32xf32>
    %105 = arith.mulf %103, %104 : vector<16x32xf32>
    %106 = vector.broadcast %2 : vector<1x32xf32> to vector<16x32xf32>
    %107 = arith.addf %105, %106 : vector<16x32xf32>
    %c0_29 = arith.constant 0 : index
    %c32 = arith.constant 32 : index
    %108 = vector.load %arg6[%c0_29, %c32] : memref<16x128xf32, #tpu.memory_space<vmem>>, vector<16x32xf32>
    tpu.vector_store %arg6[%c0_29, %c32], %107 {strides = array<i32>} : memref<16x128xf32, #tpu.memory_space<vmem>>, vector<16x32xf32>,
    %109 = vector.extract_strided_slice %7 {offsets = [0, 2], sizes = [16, 1], strides = [1, 1]} : vector<16x8xi32> to vector<16x1xi32>
    %110 = vector.broadcast %109 : vector<16x1xi32> to vector<16x51xi32>
    %111 = arith.cmpi eq, %110, %8 : vector<16x51xi32>
    %112 = arith.extui %111 : vector<16x51xi1> to vector<16x51xi32>
    %113 = arith.sitofp %112 : vector<16x51xi32> to vector<16x51xf32>
    %cst_30 = arith.constant dense<0.000000e+00> : vector<16x32xf32>
    %114 = tpu.matmul %113, %0, %cst_30 {dimension_numbers = #tpu.dot_dimension_numbers<[1], [0], [0], [1], [0, 0, 1, 1], [], []>} : vector<16x51xf32>, vector<51x32xf32>, vector<16x32xf32> -> vector<16x32xf32>
    %c2 = arith.constant 2 : index
    %c0_31 = arith.constant 0 : index
    %c0_32 = arith.constant 0 : index
    %115 = vector.load %arg3[%c2, %c0_31, %c0_32] : memref<4x16x32xf32, #tpu.memory_space<vmem>>, vector<1x16x32xf32>
    %116 = vector.shape_cast %115 : vector<1x16x32xf32> to vector<16x32xf32>
    %117 = arith.addf %114, %116 : vector<16x32xf32>
    %118 = vector.extract_strided_slice %7 {offsets = [0, 6], sizes = [16, 1], strides = [1, 1]} : vector<16x8xi32> to vector<16x1xi32>
    %c1_i32_33 = arith.constant 1 : i32
    %119 = vector.broadcast %c1_i32_33 : i32 to vector<16x1xi32>
    %120 = arith.cmpi eq, %118, %119 : vector<16x1xi32>
    %c2_i32_34 = arith.constant 2 : i32
    %121 = vector.broadcast %c2_i32_34 : i32 to vector<16x1xi32>
    %122 = arith.cmpi eq, %118, %121 : vector<16x1xi32>
    %123 = vector.shape_cast %122 : vector<16x1xi1> to vector<16x1xi1>
    %124 = vector.broadcast %123 : vector<16x1xi1> to vector<16x32xi1>
    %125 = vector.shape_cast %6 : vector<1x32xf32> to vector<1x32xf32>
    %126 = vector.broadcast %125 : vector<1x32xf32> to vector<16x32xf32>
    %127 = vector.shape_cast %4 : vector<1x32xf32> to vector<1x32xf32>
    %128 = vector.broadcast %127 : vector<1x32xf32> to vector<16x32xf32>
    %129 = arith.select %124, %126, %128 : vector<16x32xi1>, vector<16x32xf32>
    %130 = vector.shape_cast %120 : vector<16x1xi1> to vector<16x1xi1>
    %131 = vector.broadcast %130 : vector<16x1xi1> to vector<16x32xi1>
    %132 = vector.shape_cast %5 : vector<1x32xf32> to vector<1x32xf32>
    %133 = vector.broadcast %132 : vector<1x32xf32> to vector<16x32xf32>
    %134 = arith.select %131, %133, %129 : vector<16x32xi1>, vector<16x32xf32>
    %135 = arith.addf %117, %134 : vector<16x32xf32>
    %cst_35 = arith.constant dense<0.000000e+00> : vector<16xf32>
    %136 = vector.multi_reduction <add>, %135, %cst_35 [1] : vector<16x32xf32> to vector<16xf32>
    %137 = vector.shape_cast %136 : vector<16xf32> to vector<16x1xf32>
    %cst_36 = arith.constant 3.200000e+01 : f32
    %138 = vector.broadcast %cst_36 : f32 to vector<16x1xf32>
    %139 = arith.divf %137, %138 : vector<16x1xf32>
    %140 = vector.broadcast %139 : vector<16x1xf32> to vector<16x32xf32>
    %141 = arith.subf %135, %140 : vector<16x32xf32>
    %142 = arith.mulf %141, %141 : vector<16x32xf32>
    %cst_37 = arith.constant dense<0.000000e+00> : vector<16xf32>
    %143 = vector.multi_reduction <add>, %142, %cst_37 [1] : vector<16x32xf32> to vector<16xf32>
    %144 = vector.shape_cast %143 : vector<16xf32> to vector<16x1xf32>
    %cst_38 = arith.constant 3.200000e+01 : f32
    %145 = vector.broadcast %cst_38 : f32 to vector<16x1xf32>
    %146 = arith.divf %144, %145 : vector<16x1xf32>
    %147 = vector.broadcast %139 : vector<16x1xf32> to vector<16x32xf32>
    %148 = arith.subf %135, %147 : vector<16x32xf32>
    %cst_39 = arith.constant 9.99999997E-7 : f32
    %149 = vector.broadcast %cst_39 : f32 to vector<16x1xf32>
    %150 = arith.addf %146, %149 : vector<16x1xf32>
    %151 = math.rsqrt %150 : vector<16x1xf32>
    %152 = vector.broadcast %151 : vector<16x1xf32> to vector<16x32xf32>
    %153 = arith.mulf %148, %152 : vector<16x32xf32>
    %154 = vector.broadcast %1 : vector<1x32xf32> to vector<16x32xf32>
    %155 = arith.mulf %153, %154 : vector<16x32xf32>
    %156 = vector.broadcast %2 : vector<1x32xf32> to vector<16x32xf32>
    %157 = arith.addf %155, %156 : vector<16x32xf32>
    %c0_40 = arith.constant 0 : index
    %c64 = arith.constant 64 : index
    %158 = vector.load %arg6[%c0_40, %c64] : memref<16x128xf32, #tpu.memory_space<vmem>>, vector<16x32xf32>
    tpu.vector_store %arg6[%c0_40, %c64], %157 {strides = array<i32>} : memref<16x128xf32, #tpu.memory_space<vmem>>, vector<16x32xf32>,
    %159 = vector.extract_strided_slice %7 {offsets = [0, 3], sizes = [16, 1], strides = [1, 1]} : vector<16x8xi32> to vector<16x1xi32>
    %160 = vector.broadcast %159 : vector<16x1xi32> to vector<16x51xi32>
    %161 = arith.cmpi eq, %160, %8 : vector<16x51xi32>
    %162 = arith.extui %161 : vector<16x51xi1> to vector<16x51xi32>
    %163 = arith.sitofp %162 : vector<16x51xi32> to vector<16x51xf32>
    %cst_41 = arith.constant dense<0.000000e+00> : vector<16x32xf32>
    %164 = tpu.matmul %163, %0, %cst_41 {dimension_numbers = #tpu.dot_dimension_numbers<[1], [0], [0], [1], [0, 0, 1, 1], [], []>} : vector<16x51xf32>, vector<51x32xf32>, vector<16x32xf32> -> vector<16x32xf32>
    %c3 = arith.constant 3 : index
    %c0_42 = arith.constant 0 : index
    %c0_43 = arith.constant 0 : index
    %165 = vector.load %arg3[%c3, %c0_42, %c0_43] : memref<4x16x32xf32, #tpu.memory_space<vmem>>, vector<1x16x32xf32>
    %166 = vector.shape_cast %165 : vector<1x16x32xf32> to vector<16x32xf32>
    %167 = arith.addf %164, %166 : vector<16x32xf32>
    %168 = vector.extract_strided_slice %7 {offsets = [0, 7], sizes = [16, 1], strides = [1, 1]} : vector<16x8xi32> to vector<16x1xi32>
    %c1_i32_44 = arith.constant 1 : i32
    %169 = vector.broadcast %c1_i32_44 : i32 to vector<16x1xi32>
    %170 = arith.cmpi eq, %168, %169 : vector<16x1xi32>
    %c2_i32_45 = arith.constant 2 : i32
    %171 = vector.broadcast %c2_i32_45 : i32 to vector<16x1xi32>
    %172 = arith.cmpi eq, %168, %171 : vector<16x1xi32>
    %173 = vector.shape_cast %172 : vector<16x1xi1> to vector<16x1xi1>
    %174 = vector.broadcast %173 : vector<16x1xi1> to vector<16x32xi1>
    %175 = vector.shape_cast %6 : vector<1x32xf32> to vector<1x32xf32>
    %176 = vector.broadcast %175 : vector<1x32xf32> to vector<16x32xf32>
    %177 = vector.shape_cast %4 : vector<1x32xf32> to vector<1x32xf32>
    %178 = vector.broadcast %177 : vector<1x32xf32> to vector<16x32xf32>
    %179 = arith.select %174, %176, %178 : vector<16x32xi1>, vector<16x32xf32>
    %180 = vector.shape_cast %170 : vector<16x1xi1> to vector<16x1xi1>
    %181 = vector.broadcast %180 : vector<16x1xi1> to vector<16x32xi1>
    %182 = vector.shape_cast %5 : vector<1x32xf32> to vector<1x32xf32>
    %183 = vector.broadcast %182 : vector<1x32xf32> to vector<16x32xf32>
    %184 = arith.select %181, %183, %179 : vector<16x32xi1>, vector<16x32xf32>
    %185 = arith.addf %167, %184 : vector<16x32xf32>
    %cst_46 = arith.constant dense<0.000000e+00> : vector<16xf32>
    %186 = vector.multi_reduction <add>, %185, %cst_46 [1] : vector<16x32xf32> to vector<16xf32>
    %187 = vector.shape_cast %186 : vector<16xf32> to vector<16x1xf32>
    %cst_47 = arith.constant 3.200000e+01 : f32
    %188 = vector.broadcast %cst_47 : f32 to vector<16x1xf32>
    %189 = arith.divf %187, %188 : vector<16x1xf32>
    %190 = vector.broadcast %189 : vector<16x1xf32> to vector<16x32xf32>
    %191 = arith.subf %185, %190 : vector<16x32xf32>
    %192 = arith.mulf %191, %191 : vector<16x32xf32>
    %cst_48 = arith.constant dense<0.000000e+00> : vector<16xf32>
    %193 = vector.multi_reduction <add>, %192, %cst_48 [1] : vector<16x32xf32> to vector<16xf32>
    %194 = vector.shape_cast %193 : vector<16xf32> to vector<16x1xf32>
    %cst_49 = arith.constant 3.200000e+01 : f32
    %195 = vector.broadcast %cst_49 : f32 to vector<16x1xf32>
    %196 = arith.divf %194, %195 : vector<16x1xf32>
    %197 = vector.broadcast %189 : vector<16x1xf32> to vector<16x32xf32>
    %198 = arith.subf %185, %197 : vector<16x32xf32>
    %cst_50 = arith.constant 9.99999997E-7 : f32
    %199 = vector.broadcast %cst_50 : f32 to vector<16x1xf32>
    %200 = arith.addf %196, %199 : vector<16x1xf32>
    %201 = math.rsqrt %200 : vector<16x1xf32>
    %202 = vector.broadcast %201 : vector<16x1xf32> to vector<16x32xf32>
    %203 = arith.mulf %198, %202 : vector<16x32xf32>
    %204 = vector.broadcast %1 : vector<1x32xf32> to vector<16x32xf32>
    %205 = arith.mulf %203, %204 : vector<16x32xf32>
    %206 = vector.broadcast %2 : vector<1x32xf32> to vector<16x32xf32>
    %207 = arith.addf %205, %206 : vector<16x32xf32>
    %c0_51 = arith.constant 0 : index
    %c96 = arith.constant 96 : index
    %208 = vector.load %arg6[%c0_51, %c96] : memref<16x128xf32, #tpu.memory_space<vmem>>, vector<16x32xf32>
    tpu.vector_store %arg6[%c0_51, %c96], %207 {strides = array<i32>} : memref<16x128xf32, #tpu.memory_space<vmem>>, vector<16x32xf32>,
    return
  }
  func.func @transform_0(%arg0: i32) -> (i32, i32) {
    %c0_i32 = arith.constant 0 : i32
    %c0_i32_0 = arith.constant 0 : i32
    return %arg0, %c0_i32 : i32, i32
  }
  func.func @transform_1(%arg0: i32) -> (i32, i32) {
    %c0_i32 = arith.constant 0 : i32
    %c0_i32_0 = arith.constant 0 : i32
    %c0_i32_1 = arith.constant 0 : i32
    return %c0_i32, %c0_i32_0 : i32, i32
  }
  func.func @transform_2(%arg0: i32) -> (i32, i32, i32) {
    %c0_i32 = arith.constant 0 : i32
    %c0_i32_0 = arith.constant 0 : i32
    %c0_i32_1 = arith.constant 0 : i32
    %c0_i32_2 = arith.constant 0 : i32
    return %c0_i32, %c0_i32_0, %c0_i32_1 : i32, i32, i32
  }
  func.func @transform_3(%arg0: i32) -> (i32, i32) {
    %c0_i32 = arith.constant 0 : i32
    %c0_i32_0 = arith.constant 0 : i32
    %c0_i32_1 = arith.constant 0 : i32
    return %c0_i32, %c0_i32_0 : i32, i32
  }
  func.func @transform_4(%arg0: i32) -> (i32, i32) {
    %c0_i32 = arith.constant 0 : i32
    %c0_i32_0 = arith.constant 0 : i32
    %c0_i32_1 = arith.constant 0 : i32
    return %c0_i32, %c0_i32_0 : i32, i32
  }
  func.func @transform_5(%arg0: i32) -> (i32, i32) {
    %c0_i32 = arith.constant 0 : i32
    %c0_i32_0 = arith.constant 0 : i32
    return %arg0, %c0_i32 : i32, i32
  }
}

</mosaic_0001>

<bundles_post_ra>
// kernel: tpu_custom_call.1
= control target key start
LH: loop header
LB: loop body
LE: loop exit
PB: predicated region body
PF: predicated region fallthrough
CT: control target
= control target key end

     0   :  { %v962_v1 = vmov 1   ;;  %v963_v2 = vmov 0   ;;  %s1213_s0 = inlined_call_operand.vmem [shape: s32[16,8], index: 0, kind: input, shape index: {}]   ;;  %s1214_s1 = inlined_call_operand.vmem [shape: f32[51,32], index: 1, kind: input, shape index: {}]   ;;  %s1215_s2 = inlined_call_operand.vmem [shape: f32[4,16,32], index: 2, kind: input, shape index: {}]   ;;  %s1216_s3 = inlined_call_operand.vmem [shape: f32[3,32], index: 3, kind: input, shape index: {}]   ;;  %s1217_s4 = inlined_call_operand.vmem [shape: f32[2,32], index: 4, kind: input, shape index: {}]   ;;  %s1218_s5 = inlined_call_operand.hbm [shape: f32[16,128], index: 5, kind: output, shape index: {}]  }
   0x1   :  { %v31_v0 = vld [vmem:[%s1213_s0] sm:$0xff]  ;;  %908 = vset.pattern.permute.xlu1 %v962_v1  ;;  %907 = vset.pattern.permute.xlu0 %v963_v2  ;;  %v22_v4 = vld [vmem:[%s1214_s1 + $0x8] sm:$0xff]  ;;  %v23_v5 = vld [vmem:[%s1214_s1 + $0x10] sm:$0xff] }
   0x2   :  { %v21_v3 = vld [vmem:[%s1214_s1] sm:$0xff]  ;;  %220 = vperm.xlu1 %908, %v31_v0   ;;  %36 = vperm.xlu0 %907, %v31_v0   ;;  %v24_v7 = vld [vmem:[%s1214_s1 + $0x18] sm:$0xff]  ;;  %v32_v8 = vld [vmem:[%s1213_s0 + $0x8] sm:$0xff] }
   0x3   :  { %v1019_v6 = vpack.c.bf16 %v22_v4, %v21_v3  ;;  %v1027_v9 = vpack.c.bf16 %v24_v7, %v23_v5 }
   0x4   :  { %10 = vsyncpa [#allocation3], 0  ;;  %v25_v10 = vld [vmem:[%s1214_s1 + $0x20] sm:$0xff]  ;;  %v26_v11 = vld [vmem:[%s1214_s1 + $0x28] sm:$0xff]  ;;  %v964_v13 = vmov 2   ;;  %vm56_vm0 = vcmask 1042432   ;;  %v33_v24 = vlaneseq }
   0x5   :  { %845 = vmatprep.subr.bf16.mxu0 %v1019_v6  ;;  %857 = vmatprep.subr.bf16.mxu1 %v1019_v6  ;;  %v1041_v12 = vpack.c.bf16 %v26_v11, %v25_v10  ;;  %v1048_v14 = vld [vmem:[%s1214_s1 + $0x30] sm:$0x7]  ;;  %v965_v15 = vmov 3   ;;  %vm137_vm1 = vcmp.eq.s32.totalorder %v31_v0, 2  ;;  %vm138_vm2 = vcmp.eq.s32.totalorder %v32_v8, 2  ;;  %v48_v5 = vld [vmem:[%s1215_s2 + $0x8] sm:$0xff] }
   0x6   :  { %847 = vmatpush3.bf16.msra.mxu0 %v1019_v6  ;;  %859 = vmatpush3.bf16.msra.mxu1 %v1019_v6  ;;  %v966_v16 = vmov 5   ;;  %v139_v17 = vsel %vm137_vm1, 1, %v963_v2  ;;  %vm135_vm3 = vcmp.eq.s32.totalorder %v31_v0, 1  ;;  %v140_v18 = vsel %vm138_vm2, 1, %v963_v2  ;;  %v30_v61 = vld [vmem:[%s1216_s3] sm:$0x7] }
   0x7   :  { %223 = vperm.xlu1 %908, %v32_v8   ;;  %39 = vperm.xlu0 %907, %v32_v8   ;;  %v159_v19 = vsel %vm135_vm3, 1, %v963_v2  ;;  %vm136_vm4 = vcmp.eq.s32.totalorder %v32_v8, 1  ;;  %v967_v21 = vmov 6   ;;  %v968_v22 = vmov 7   ;;  %s971_s29 = smov 32   ;;  %s973_s30 = smov 96  }
   0x8   :  { %849 = vmatprep.subr.bf16.mxu0 %v1027_v9  ;;  %861 = vmatprep.subr.bf16.mxu1 %v1027_v9  ;;  %v160_v20 = vsel %vm136_vm4, 1, %v963_v2  ;;  %v969_v23 = vmov 4   ;;  %v34_v25 = vand.u32 127, %v33_v24  ;;  %vm49_vm5 = vcmask 416768   ;;  %s974_s6 = smov [#allocation2]  }
   0x9   :  { %v970_v28 = vmov 0.0   ;;  %v150_v56 = vshrl.u32 %v33_v24, 7  ;;  %s701_s7 = sshll.u32 %s974_s6, 4  ;;  %s702_s7 = int_to_ptr.vmem [resolvable:$true] %s701_s7 }
   0xa   :  { %851 = vmatpush3.bf16.msra.mxu0 %v1027_v9  ;;  %863 = vmatpush3.bf16.msra.mxu1 %v1027_v9  ;;  %s938_s8 = scalar_lea.vmem %s702_s7, 256  ;;  %p943_p1 = scmp.lt.s32.totalorder %s702_s7, %s702_s7 }
   0xb   :  { %910 = vset.pattern.permute.xlu1 %v964_v13  ;;  %909 = vset.pattern.permute.xlu0 %v964_v13  ;;  %v151_v58 = vsub.s32 2, %v150_v56  ;;  %v155_v59 = vsub.s32 0, %v150_v56  ;;  %v171_v62 = vsub.s32 1, %v150_v56  ;;  %p939_p0 = scmp.ne.s32.totalorder %s702_s7, %s938_s8  ;;  %p944_p2 = scmp.lt.s32.totalorder %s938_s8, %s938_s8 }
   0xc   :  { %382 = vperm.xlu1 %910, %v32_v8   ;;  %379 = vperm.xlu0 %909, %v31_v0  }
   0xd   :  { %853 = vmatprep.subr.bf16.mxu0 %v1041_v12  ;;  %865 = vmatprep.subr.bf16.mxu1 %v1041_v12  ;;  %v156_v1 = vrot.slane %v30_v61, %v155_v59  ;;  %v172_v3 = vrot.slane %v30_v61, %v171_v62  ;;  %p945_p3 = por %p944_p2, %p943_p1 }
   0xe   :  { %855 = vmatpush3.bf16.msra.mxu0 %v1041_v12  ;;  %867 = vmatpush3.bf16.msra.mxu1 %v1041_v12 }
   0xf   :  { %788 = vmatprep.subr.msk.mxu0 %vm56_vm0, %v1048_v14  ;;  %805 = vmatprep.subr.msk.mxu1 %vm56_vm0, %v1048_v14  ;;  %p946_p4 = pnand %p945_p3, %p939_p0 }
  0x10   :  { %911 = vset.pattern.permute.xlu1 %v965_v15  ;;  %912 = vset.pattern.permute.xlu0 %v965_v15 }
  0x11   :  { %538 = vperm.xlu1 %911, %v31_v0   ;;  %541 = vperm.xlu0 %912, %v32_v8   ;;  %v152_v0 = vrot.slane %v30_v61, %v151_v58  ;;  %v47_v8 = vld [vmem:[%s1215_s2] sm:$0xff] }
  0x12   :  { %789 = vmatpush3.msk.msra.mxu0 %vm56_vm0, %v1048_v14  ;;  %806 = vmatpush3.msk.msra.mxu1 %vm56_vm0, %v1048_v14 }
  0x13   :  { %869 = vmatprep.subr.bf16.mxu0 %v1019_v6  ;;  %881 = vmatprep.subr.bf16.mxu1 %v1019_v6 }
  0x15   :  { %913 = vset.pattern.permute.xlu1 %v966_v16  ;;  %914 = vset.pattern.permute.xlu0 %v966_v16 }
  0x16   :  { %316 = vperm.xlu1 %913, %v139_v17   ;;  %326 = vperm.xlu0 %914, %v159_v19  }
  0x1a   :  { %319 = vperm.xlu1 %913, %v140_v18   ;;  %916 = vset.pattern.permute.xlu0 %v967_v21 }
  0x1b   :  { %478 = vperm.xlu0 %916, %v140_v18  }
  0x1e   :  { %329 = vperm.xlu1 %913, %v160_v20  }
  0x1f   :  { %917 = vset.pattern.permute.xlu0 %v968_v22 }
  0x20   :  { %634 = vperm.xlu0 %917, %v139_v17  }
  0x22   :  { %915 = vset.pattern.permute.xlu1 %v967_v21 }
  0x23   :  { %475 = vperm.xlu1 %915, %v139_v17  }
  0x24   :  { %647 = vperm.xlu0 %917, %v160_v20  }
  0x27   :  { %485 = vperm.xlu1 %915, %v159_v19  }
  0x28   :  { %920 = vset.pattern.permute.xlu0 %v969_v23 }
  0x29   :  { %145 = vperm.xlu0 %920, %v140_v18  }
  0x2b   :  { %488 = vperm.xlu1 %915, %v160_v20  }
  0x2d   :  { %921 = vset.pattern.permute.xlu0 %v968_v22 }
  0x2f   :  { %918 = vset.pattern.permute.xlu1 %v968_v22 }
  0x30   :  { %637 = vperm.xlu1 %918, %v140_v18  }
  0x34   :  { %644 = vperm.xlu1 %918, %v159_v19  }
  0x38   :  { %919 = vset.pattern.permute.xlu1 %v969_v23 }
  0x39   :  { %142 = vperm.xlu1 %919, %v139_v17  }
  0x3d   :  { %162 = vperm.xlu1 %919, %v159_v19  }
  0x41   :  { %165 = vperm.xlu1 %919, %v160_v20  }
  0x81   :  { %v221_v26 = vpop.permute.xlu1 %220  ;;  %v37_v27 = vpop.permute.xlu0 %36 }
  0x82   :  { %vm225_vm6 = vcmp.eq.s32.totalorder %v221_v26, %v34_v25  ;;  %vm41_vm7 = vcmp.eq.s32.totalorder %v37_v27, %v34_v25 }
  0x83   :  { %v712_v29 = vsel %vm41_vm7, 1.0, %v970_v28  ;;  %v719_v30 = vsel %vm225_vm6, 1.0, %v970_v28  ;;  %vm177_vm6 = vcmask 261120  }
  0x84   :  { %790 = vmatprep.mubr.msk.f32.mxu0 %vm49_vm5, %v712_v29  ;;  %807 = vmatprep.mubr.msk.f32.mxu1 %vm49_vm5, %v719_v30 }
  0x86   :  { %v224_v31 = vpop.permute.xlu1 %223  ;;  %v40_v32 = vpop.permute.xlu0 %39 }
  0x87   :  { %vm226_vm8 = vcmp.eq.s32.totalorder %v224_v31, %v34_v25  ;;  %vm42_vm9 = vcmp.eq.s32.totalorder %v40_v32, %v34_v25  ;;  %v729_v31 = vld [vmem:[%s1215_s2 + $0x28] sm:$0xff]  ;;  %v736_v32 = vld [vmem:[%s1215_s2 + $0x38] sm:$0xff] }
  0x88   :  { %v720_v33 = vsel %vm226_vm8, 1.0, %v970_v28  ;;  %v713_v34 = vsel %vm42_vm9, 1.0, %v970_v28 }
  0x89   :  { %791 = vmatmul.mubr.msk.f32.vlgmr.msra.gmra.mrb[0].mxu0 %vm49_vm5, %v713_v34  ;;  %808 = vmatmul.mubr.msk.f32.vlgmr.msra.gmra.mrb[0].mxu1 %vm49_vm5, %v720_v33  ;;  %v728_v34 = vld [vmem:[%s1215_s2 + $0x20] sm:$0xff] }
  0x8a   :  { %871 = vmatpush3.bf16.msra.mxu0 %v1019_v6  ;;  %883 = vmatpush3.bf16.msra.mxu1 %v1019_v6  ;;  %v722_v6 = vld [vmem:[%s1215_s2 + $0x18] sm:$0xff] }
  0x8b   :  { %873 = vmatprep.subr.bf16.mxu0 %v1027_v9  ;;  %885 = vmatprep.subr.bf16.mxu1 %v1027_v9  ;;  %v383_v35 = vpop.permute.xlu1 %382  ;;  %v380_v36 = vpop.permute.xlu0 %379 }
  0x8c   :  { %vm384_vm10 = vcmp.eq.s32.totalorder %v380_v36, %v34_v25  ;;  %vm385_vm11 = vcmp.eq.s32.totalorder %v383_v35, %v34_v25  ;;  %v735_v35 = vld [vmem:[%s1215_s2 + $0x30] sm:$0xff] }
  0x8d   :  { %v726_v37 = vsel %vm384_vm10, 1.0, %v970_v28  ;;  %v727_v41 = vsel %vm385_vm11, 1.0, %v970_v28 }
  0x8e   :  { %875 = vmatpush3.bf16.msra.mxu0 %v1027_v9  ;;  %887 = vmatpush3.bf16.msra.mxu1 %v1027_v9  ;;  %v721_v9 = vld [vmem:[%s1215_s2 + $0x10] sm:$0xff] }
  0x8f   :  { %877 = vmatprep.subr.bf16.mxu0 %v1041_v12  ;;  %889 = vmatprep.subr.bf16.mxu1 %v1041_v12 }
  0x90   :  { %v539_v38 = vpop.permute.xlu1 %538  ;;  %v542_v39 = vpop.permute.xlu0 %541  ;;  %824 = vmatprep.mubr.msk.f32.mxu0 %vm49_vm5, %v726_v37 }
  0x91   :  { %vm543_vm12 = vcmp.eq.s32.totalorder %v539_v38, %v34_v25  ;;  %vm544_vm13 = vcmp.eq.s32.totalorder %v542_v39, %v34_v25 }
  0x92   :  { %879 = vmatpush3.bf16.msra.mxu0 %v1041_v12  ;;  %891 = vmatpush3.bf16.msra.mxu1 %v1041_v12  ;;  %v733_v40 = vsel %vm543_vm12, 1.0, %v970_v28  ;;  %v734_v42 = vsel %vm544_vm13, 1.0, %v970_v28 }
  0x93   :  { %822 = vmatprep.subr.msk.mxu0 %vm56_vm0, %v1048_v14  ;;  %839 = vmatprep.subr.msk.mxu1 %vm56_vm0, %v1048_v14 }
  0x94   :  { %841 = vmatprep.mubr.msk.f32.mxu1 %vm49_vm5, %v733_v40 }
  0x95   :  { %v317_v43 = vpop.permute.xlu1 %316  ;;  %v327_v49 = vpop.permute.xlu0 %326 }
  0x96   :  { %823 = vmatpush3.msk.msra.mxu0 %vm56_vm0, %v1048_v14  ;;  %840 = vmatpush3.msk.msra.mxu1 %vm56_vm0, %v1048_v14  ;;  %vm321_vm1 = vcmp.eq.s32.totalorder %v317_v43, 1 }
  0x97   :  { %825 = vmatmul.mubr.msk.f32.vlgmr.msra.gmra.mrb[2].mxu0 %vm49_vm5, %v727_v41  ;;  %842 = vmatmul.mubr.msk.f32.vlgmr.msra.gmra.mrb[2].mxu1 %vm49_vm5, %v734_v42  ;;  %v323_v10 = vsel %vm321_vm1, %v152_v0, %v156_v1  ;;  %vm331_vm5 = vcmp.eq.s32.totalorder %v327_v49, 1  ;;  %vm693_vm1 = vcmask 1048320  }
  0x98   :  { %v333_v22 = vsel %vm331_vm5, %v172_v3, %v323_v10 }
  0x99   :  { %v320_v44 = vpop.permute.xlu1 %319 }
  0x9a   :  { %v1096_v51 = vpop.permute.xlu0 %478  ;;  %vm322_vm0 = vcmp.eq.s32.totalorder %v320_v44, 1 }
  0x9b   :  { %v324_v7 = vsel %vm322_vm0, %v152_v0, %v156_v1  ;;  %vm481_vm9 = vcmp.eq.s32.totalorder %v1096_v51, 1  ;;  %vm534_vm0 = vcmask 785920  }
  0x9c   :  { %v483_v33 = vsel %vm481_vm9, %v152_v0, %v156_v1 }
  0x9d   :  { %v330_v45 = vpop.permute.xlu1 %329 }
  0x9e   :  { %vm332_vm4 = vcmp.eq.s32.totalorder %v330_v45, 1 }
  0x9f   :  { %v635_v53 = vpop.permute.xlu0 %634  ;;  %v334_v19 = vsel %vm332_vm4, %v172_v3, %v324_v7 }
  0xa0   :  { %vm639_vm8 = vcmp.eq.s32.totalorder %v635_v53, 1 }
  0xa1   :  { %v641_v30 = vsel %vm639_vm8, %v152_v0, %v156_v1 }
  0xa2   :  { %v1090_v46 = vpop.permute.xlu1 %475 }
  0xa3   :  { %v1100_v55 = vpop.permute.xlu0 %647  ;;  %vm480_vm10 = vcmp.eq.s32.totalorder %v1090_v46, 1 }
  0xa4   :  { %vm650_vm11 = vcmp.eq.s32.totalorder %v1100_v55, 1  ;;  %v482_v36 = vsel %vm480_vm10, %v152_v0, %v156_v1 }
  0xa6   :  { %v1092_v47 = vpop.permute.xlu1 %485 }
  0xa8   :  { %v146_v60 = vpop.permute.xlu0 %145 }
  0xa9   :  { %vm148_vm14 = vcmp.eq.s32.totalorder %v146_v60, 1 }
  0xaa   :  { %v1094_v48 = vpop.permute.xlu1 %488  ;;  %v158_v2 = vsel %vm148_vm14, %v152_v0, %v156_v1  ;;  %vm490_vm14 = vcmp.eq.s32.totalorder %v1092_v47, 1 }
  0xab   :  { %vm491_vm13 = vcmp.eq.s32.totalorder %v1094_v48, 1 }
  0xac   :  { %v493_v49 = vsel %vm491_vm13, %v172_v3, %v483_v33 }
  0xaf   :  { %v638_v50 = vpop.permute.xlu1 %637 }
  0xb0   :  { %vm640_vm7 = vcmp.eq.s32.totalorder %v638_v50, 1  ;;  %v492_v50 = vsel %vm490_vm14, %v172_v3, %v482_v36 }
  0xb1   :  { %v642_v29 = vsel %vm640_vm7, %v152_v0, %v156_v1 }
  0xb2   :  { %v652_v37 = vsel %vm650_vm11, %v172_v3, %v642_v29 }
  0xb3   :  { %v1098_v52 = vpop.permute.xlu1 %644 }
  0xb4   :  { %vm649_vm12 = vcmp.eq.s32.totalorder %v1098_v52, 1 }
  0xb5   :  { %v651_v44 = vsel %vm649_vm12, %v172_v3, %v641_v30 }
  0xb8   :  { %v143_v54 = vpop.permute.xlu1 %142 }
  0xb9   :  { %vm147_vm15 = vcmp.eq.s32.totalorder %v143_v54, 1 }
  0xba   :  { %v157_v4 = vsel %vm147_vm15, %v152_v0, %v156_v1  ;;  %vm375_vm15 = vcmask 523520  }
  0xbc   :  { %v163_v57 = vpop.permute.xlu1 %162 }
  0xbd   :  { %vm167_vm3 = vcmp.eq.s32.totalorder %v163_v57, 1 }
  0xbe   :  { %v173_v14 = vsel %vm167_vm3, %v172_v3, %v157_v4 }
  0xc0   :  { %v166_v63 = vpop.permute.xlu1 %165 }
  0xc1   :  { %vm168_vm2 = vcmp.eq.s32.totalorder %v166_v63, 1 }
  0xc2   :  { %v174_v11 = vsel %vm168_vm2, %v172_v3, %v158_v2 }
 0x15c   :  { %v792_v12 = vpop.f32.mrb[0].mxu0  ;;  %v809_v13 = vpop.f32.mrb[0].mxu1 }
 0x15d   :  { %v132_v15 = vadd.f32 %v792_v12, %v48_v5  ;;  %v312_v16 = vadd.f32 %v809_v13, %v722_v6  ;;  %v126_v17 = vpop.f32.mrb[1].mxu0  ;;  %v306_v18 = vpop.f32.mrb[1].mxu1 }
 0x15e   :  { %v127_v20 = vadd.f32 %v126_v17, %v47_v8  ;;  %v307_v21 = vadd.f32 %v721_v9, %v306_v18 }
 0x15f   :  { %v336_v23 = vadd.f32 %v334_v19, %v312_v16  ;;  %v1117_v24 = vadd.f32 %v174_v11, %v132_v15 }
 0x160   :  { %v335_v25 = vadd.f32 %v333_v22, %v307_v21  ;;  %v1119_v26 = vadd.f32 %v173_v14, %v127_v20 }
 0x161   :  { %v340_v27 = vsel %vm177_vm6, %v336_v23, 0.0  ;;  %v181_v58 = vsel %vm177_vm6, %v1117_v24, 0.0 }
 0x162   :  { %341 = vadd.xlane.f32.xlu1 %v340_v27  ;;  %v337_v28 = vsel %vm177_vm6, %v335_v25, 0.0  ;;  %v178_v52 = vsel %vm177_vm6, %v1119_v26, 0.0 }
 0x163   :  { %338 = vadd.xlane.f32.xlu0 %v337_v28 }
 0x16a   :  { %v826_v38 = vpop.f32.mrb[2].mxu0  ;;  %v843_v39 = vpop.f32.mrb[2].mxu1 }
 0x16b   :  { %v471_v40 = vadd.f32 %v826_v38, %v729_v31  ;;  %v630_v41 = vadd.f32 %v843_v39, %v736_v32  ;;  %v465_v42 = vpop.f32.mrb[3].mxu0  ;;  %v624_v43 = vpop.f32.mrb[3].mxu1 }
 0x16c   :  { %v466_v45 = vadd.f32 %v728_v34, %v465_v42  ;;  %v625_v46 = vadd.f32 %v735_v35, %v624_v43 }
 0x16d   :  { %v495_v51 = vadd.f32 %v493_v49, %v471_v40  ;;  %v654_v53 = vadd.f32 %v652_v37, %v630_v41 }
 0x16e   :  { %v653_v54 = vadd.f32 %v651_v44, %v625_v46  ;;  %v494_v47 = vadd.f32 %v492_v50, %v466_v45  ;;  %v717_v44 = vld [vmem:[%s1217_s4] ss:$0 sm:$0xff]  ;;  %v718_v50 = vld [vmem:[%s1217_s4 + $0x1] ss:$0 sm:$0xff]  ;;  %s972_s4 = smov 64  }
 0x16f   :  { %v499_v55 = vsel %vm177_vm6, %v495_v51, 0.0  ;;  %v658_v48 = vsel %vm177_vm6, %v654_v53, 0.0 }
 0x170   :  { %500 = vadd.xlane.f32.xlu0 %v499_v55  ;;  %v655_v56 = vsel %vm177_vm6, %v653_v54, 0.0  ;;  %v496_v57 = vsel %vm177_vm6, %v494_v47, 0.0 }
 0x171   :  { %656 = vadd.xlane.f32.xlu1 %v655_v56 }
 0x174   :  { %497 = vadd.xlane.f32.xlu0 %v496_v57 }
 0x175   :  { %179 = vadd.xlane.f32.xlu1 %v178_v52 }
 0x178   :  { %659 = vadd.xlane.f32.xlu0 %v658_v48 }
 0x17c   :  { %182 = vadd.xlane.f32.xlu0 %v181_v58 }
 0x1ef   :  { %v342_v59 = vpop.xlane.xlu1 %341 }
 0x1f0   :  { %v344_v60 = vmul.f32 0.03125, %v342_v59  ;;  %v339_v61 = vpop.xlane.xlu0 %338 }
 0x1f1   :  { %v343_v62 = vmul.f32 0.03125, %v339_v61 }
 0x1f2   :  { %v346_v63 = vsub.f32 %v336_v23, %v344_v60 }
 0x1f3   :  { %v345_v0 = vsub.f32 %v335_v25, %v343_v62 }
 0x1f4   :  { %v348_v1 = vmul.f32 %v346_v63, %v346_v63 }
 0x1f5   :  { %v347_v2 = vmul.f32 %v345_v0, %v345_v0 }
 0x1f6   :  { %v352_v3 = vsel %vm177_vm6, %v348_v1, 0.0 }
 0x1f7   :  { %353 = vadd.xlane.f32.xlu0 %v352_v3  ;;  %v349_v4 = vsel %vm177_vm6, %v347_v2, 0.0 }
 0x1f8   :  { %350 = vadd.xlane.f32.xlu1 %v349_v4 }
 0x1fd   :  { %v501_v5 = vpop.xlane.xlu0 %500 }
 0x1fe   :  { %v503_v6 = vmul.f32 0.03125, %v501_v5  ;;  %v657_v7 = vpop.xlane.xlu1 %656 }
 0x1ff   :  { %v661_v9 = vmul.f32 0.03125, %v657_v7 }
 0x200   :  { %v1155_v8 = vsub.f32 %v495_v51, %v503_v6 }
 0x201   :  { %v498_v10 = vpop.xlane.xlu0 %497  ;;  %v1159_v14 = vsub.f32 %v653_v54, %v661_v9 }
 0x202   :  { %v502_v11 = vmul.f32 0.03125, %v498_v10  ;;  %v180_v12 = vpop.xlane.xlu1 %179  ;;  %v507_v13 = vmul.f32 %v1155_v8, %v1155_v8 }
 0x203   :  { %v185_v16 = vmul.f32 0.03125, %v180_v12  ;;  %v665_v25 = vmul.f32 %v1159_v14, %v1159_v14 }
 0x204   :  { %v1161_v15 = vsub.f32 %v494_v47, %v502_v11  ;;  %v511_v17 = vsel %vm177_vm6, %v507_v13, 0.0 }
 0x205   :  { %512 = vadd.xlane.f32.xlu0 %v511_v17  ;;  %v660_v18 = vpop.xlane.xlu0 %659  ;;  %v1167_v21 = vsub.f32 %v1119_v26, %v185_v16  ;;  %v667_v26 = vsel %vm177_vm6, %v665_v25, 0.0 }
 0x206   :  { %v662_v19 = vmul.f32 0.03125, %v660_v18  ;;  %v506_v20 = vmul.f32 %v1161_v15, %v1161_v15 }
 0x207   :  { %v189_v32 = vmul.f32 %v1167_v21, %v1167_v21 }
 0x208   :  { %v1169_v22 = vsub.f32 %v654_v53, %v662_v19  ;;  %v508_v23 = vsel %vm177_vm6, %v506_v20, 0.0 }
 0x209   :  { %v183_v27 = vpop.xlane.xlu0 %182  ;;  %509 = vadd.xlane.f32.xlu1 %v508_v23  ;;  %v191_v35 = vsel %vm177_vm6, %v189_v32, 0.0 }
 0x20a   :  { %v186_v28 = vmul.f32 0.03125, %v183_v27  ;;  %v666_v29 = vmul.f32 %v1169_v22, %v1169_v22 }
 0x20c   :  { %v1177_v30 = vsub.f32 %v1117_v24, %v186_v28  ;;  %v670_v31 = vsel %vm177_vm6, %v666_v29, 0.0 }
 0x20d   :  { %671 = vadd.xlane.f32.xlu0 %v670_v31  ;;  %668 = vadd.xlane.f32.xlu1 %v667_v26 }
 0x20e   :  { %v190_v33 = vmul.f32 %v1177_v30, %v1177_v30 }
 0x210   :  { %v194_v34 = vsel %vm177_vm6, %v190_v33, 0.0 }
 0x211   :  { %195 = vadd.xlane.f32.xlu0 %v194_v34  ;;  %192 = vadd.xlane.f32.xlu1 %v191_v35 }
 0x284   :  { %v354_v24 = vpop.xlane.xlu0 %353 }
 0x285   :  { %v356_v36 = vmul.f32 0.03125, %v354_v24  ;;  %v351_v37 = vpop.xlane.xlu1 %350 }
 0x286   :  { %v355_v38 = vmul.f32 0.03125, %v351_v37 }
 0x287   :  { %v358_v39 = vadd.f32 1e-06, %v356_v36 }
 0x288   :  { %v357_v40 = vadd.f32 1e-06, %v355_v38 }
 0x289   :  { %922 = vrsqrt.f32 %v358_v39 }
 0x28a   :  { %924 = vrsqrt.f32 %v357_v40 }
 0x292   :  { %v513_v41 = vpop.xlane.xlu0 %512 }
 0x293   :  { %v923_v42 = vpop.eup %922  ;;  %v515_v43 = vmul.f32 0.03125, %v513_v41 }
 0x294   :  { %v925_v45 = vpop.eup %924  ;;  %v362_v46 = vmul.f32 %v923_v42, %v346_v63 }
 0x295   :  { %v517_v49 = vadd.f32 1e-06, %v515_v43  ;;  %v361_v51 = vmul.f32 %v925_v45, %v345_v0 }
 0x296   :  { %v510_v53 = vpop.xlane.xlu1 %509  ;;  %v364_v54 = vmul.f32 %v717_v44, %v362_v46 }
 0x297   :  { %926 = vrsqrt.f32 %v517_v49  ;;  %v514_v47 = vmul.f32 0.03125, %v510_v53  ;;  %v363_v55 = vmul.f32 %v717_v44, %v361_v51 }
 0x298   :  { %v366_v56 = vadd.f32 %v718_v50, %v364_v54 }
 0x299   :  { %v516_v57 = vadd.f32 1e-06, %v514_v47  ;;  %v365_v52 = vadd.f32 %v718_v50, %v363_v55 }
 0x29a   :  { %v672_v48 = vpop.xlane.xlu0 %671  ;;  %v669_v58 = vpop.xlane.xlu1 %668  ;;  %371 = vrot.lane.b32.xlu0 %v366_v56, %s971_s29 }
 0x29b   :  { %928 = vrsqrt.f32 %v516_v57  ;;  %v674_v59 = vmul.f32 0.03125, %v672_v48  ;;  %v673_v60 = vmul.f32 0.03125, %v669_v58  ;;  %369 = vrot.lane.b32.xlu1 %v365_v52, %s971_s29 }
 0x29d   :  { %v676_v61 = vadd.f32 1e-06, %v674_v59  ;;  %v675_v62 = vadd.f32 1e-06, %v673_v60 }
 0x29e   :  { %v196_v63 = vpop.xlane.xlu0 %195  ;;  %v193_v0 = vpop.xlane.xlu1 %192 }
 0x29f   :  { %930 = vrsqrt.f32 %v676_v61  ;;  %v198_v1 = vmul.f32 0.03125, %v196_v63  ;;  %v197_v2 = vmul.f32 0.03125, %v193_v0 }
 0x2a0   :  { %932 = vrsqrt.f32 %v675_v62 }
 0x2a1   :  { %v927_v3 = vpop.eup %926  ;;  %v200_v4 = vadd.f32 1e-06, %v198_v1  ;;  %v199_v5 = vadd.f32 1e-06, %v197_v2 }
 0x2a2   :  { %v521_v6 = vmul.f32 %v927_v3, %v1155_v8 }
 0x2a3   :  { %934 = vrsqrt.f32 %v200_v4 }
 0x2a4   :  { %936 = vrsqrt.f32 %v199_v5  ;;  %v523_v7 = vmul.f32 %v717_v44, %v521_v6 }
 0x2a5   :  { %v929_v9 = vpop.eup %928 }
 0x2a6   :  { %v525_v10 = vadd.f32 %v718_v50, %v523_v7  ;;  %v520_v11 = vmul.f32 %v929_v9, %v1161_v15 }
 0x2a8   :  { %530 = vrot.lane.b32.xlu1 %v525_v10, %s972_s4  ;;  %v522_v12 = vmul.f32 %v717_v44, %v520_v11 }
 0x2a9   :  { %v931_v13 = vpop.eup %930 }
 0x2aa   :  { %v933_v16 = vpop.eup %932  ;;  %v524_v17 = vadd.f32 %v718_v50, %v522_v12  ;;  %v680_v18 = vmul.f32 %v931_v13, %v1169_v22 }
 0x2ab   :  { %v679_v19 = vmul.f32 %v933_v16, %v1159_v14 }
 0x2ac   :  { %528 = vrot.lane.b32.xlu1 %v524_v17, %s972_s4  ;;  %v682_v20 = vmul.f32 %v717_v44, %v680_v18 }
 0x2ad   :  { %v935_v8 = vpop.eup %934  ;;  %v681_v23 = vmul.f32 %v717_v44, %v679_v19 }
 0x2ae   :  { %v937_v25 = vpop.eup %936  ;;  %v684_v27 = vadd.f32 %v718_v50, %v682_v20  ;;  %v204_v28 = vmul.f32 %v935_v8, %v1177_v30 }
 0x2af   :  { %v683_v29 = vadd.f32 %v718_v50, %v681_v23  ;;  %v203_v15 = vmul.f32 %v937_v25, %v1167_v21 }
 0x2b0   :  { %689 = vrot.lane.b32.xlu1 %v684_v27, %s973_s30  ;;  %v210_v31 = vmul.f32 %v717_v44, %v204_v28 }
 0x2b1   :  { %687 = vrot.lane.b32.xlu0 %v683_v29, %s973_s30  ;;  %v209_v26 = vmul.f32 %v717_v44, %v203_v15 }
 0x2b2   :  { %v216_v32 = vadd.f32 %v718_v50, %v210_v31 }
 0x2b3   :  { %v215_v22 = vadd.f32 %v718_v50, %v209_v26 }
 0x2b4   :  { %218 = vst.msk [vmem:[#allocation2 + $0x8] sm:$0xff] %vm177_vm6, %v216_v32 }
 0x2b5   :  { %217 = vst.msk [vmem:[#allocation2] sm:$0xff] %vm177_vm6, %v215_v22 }
 0x30c   :  { %v372_v14 = vpop.permute.xlu0 %371 }
 0x30d   :  { %377 = vst.msk [vmem:[#allocation2 + $0x8] sm:$0xff] %vm375_vm15, %v372_v14  ;;  %v370_v33 = vpop.permute.xlu1 %369 }
 0x30e   :  { %376 = vst.msk [vmem:[#allocation2] sm:$0xff] %vm375_vm15, %v370_v33 }
 0x31a   :  { %v531_v30 = vpop.permute.xlu1 %530 }
 0x31b   :  { %536 = vst.msk [vmem:[#allocation2 + $0x8] sm:$0xff] %vm534_vm0, %v531_v30 }
 0x31e   :  { %v529_v21 = vpop.permute.xlu1 %528 }
 0x31f   :  { %535 = vst.msk [vmem:[#allocation2] sm:$0xff] %vm534_vm0, %v529_v21 }
 0x322   :  { %v690_v34 = vpop.permute.xlu1 %689 }
 0x323   :  { %v688_v35 = vpop.permute.xlu0 %687  ;;  %695 = vst.msk [vmem:[#allocation2 + $0x8] sm:$0xff] %vm693_vm1, %v690_v34 }
 0x324   :  { %694 = vst.msk [vmem:[#allocation2] sm:$0xff] %vm693_vm1, %v688_v35 }
 0x325   :  { %949 = shalt.err (!%p946_p4)
}
 0x326   :  { %s950_s1 = scalar_lea.hbm %s1218_s5, 256 }
 0x327   :  { %p951_p5 = scmp.ne.s32.totalorder %s1218_s5, %s950_s1  ;;  %p954_p6 = scmp.lt.u32.totalorder %s950_s1, %s1218_s5 }
 0x329   :  { %p956_p7 = pnand %p954_p6, %p951_p5 }
 0x32b   :  { %959 = shalt.err (!%p956_p7)
}
 0x32c   :  { %s975_s14 = smov 128   ;;  %s976_s3 = smov 8  }
 0x32d   :  { %707 = dma.vmem_to_hbm [thread:$0]  %s702_s7, 256, %s1218_s5, [#allocation3], %s975_s14, %s975_s14, %s976_s3  }
 0x32e   :  { %960 = dma.done.wait [#allocation3], 256  }
 0x32f   :  { %961 = vsyncadd [#allocation3], 4294967040 }
 0x330   :  { %711 = vsyncpa [#allocation3], 1 }

</bundles_post_ra>
